<compile_context>
chip_gen: v5e
topology: v5e:2x2
jax: 0.10.0
libtpu: 0.0.40
codegen_flags: <defaults>
</compile_context>

<pallas_src>
import functools
import math

import jax
import jax.numpy as jnp
from jax import lax
from jax.experimental import pallas as pl
from jax.experimental.pallas import tpu as pltpu


def _radial_embedding_kernel(x_ref, out_ref, *, prefactor, r_max, p):
    """x_ref: (1, TN) f32 edge lengths (edges on lanes).
       out_ref: (B, TN) bessel * cutoff (basis on sublanes)."""
    x = x_ref[...]                                        # (1, TN)
    num_basis = out_ref.shape[0]

    # Bessel frequencies pi*k/r_max, k = 1..B  (compile-time constant, no DMA).
    k = lax.broadcasted_iota(jnp.int32, (num_basis, 1), 0).astype(jnp.float32) + 1.0
    w = (math.pi / r_max) * k                             # (B, 1)

    # Polynomial cutoff envelope: integer-power + Horner (VALU only, no pow()).
    u = x * (1.0 / r_max)                                 # (1, TN)
    u_p = lax.integer_pow(u, p)
    pf = float(p)
    c0 = -(pf + 1.0) * (pf + 2.0) * 0.5
    c1 = pf * (pf + 2.0)
    c2 = -pf * (pf + 1.0) * 0.5
    env = 1.0 + u_p * (c0 + u * (c1 + c2 * u))            # (1, TN)
    inside = (x < r_max).astype(jnp.float32)

    # Fused per-edge scale = prefactor * cutoff / x ; one divide per edge on the
    # narrow (1, TN) row (exact divide keeps full f32 precision).
    # NOTE: x == 0 gives inf/NaN, same as the PyTorch module.
    scale = (prefactor * env * inside) / x                # (1, TN)

    # sin(w*x) broadcasts (B,1) x (1,TN) -> (B,TN); store lane-dense.
    out_ref[...] = (jnp.sin(w * x) * scale).astype(out_ref.dtype)


def radial_embedding_block(edge_lengths, *, r_max, num_bessel,
                           num_polynomial_cutoff, tile_n=4096,
                           out_dtype=jnp.float32, transpose_output=True):
    """edge_lengths: [N, 1] (or [N]) float32 -> [N, num_bessel] (module layout).

    Set transpose_output=False to get the lane-major [num_bessel, N] result
    directly (skips the wrapper transpose for consumers that accept it).
    Set out_dtype=jnp.bfloat16 to halve output HBM traffic if the downstream
    linear tolerates bf16 (compute stays f32).
    """
    x = jnp.asarray(edge_lengths, jnp.float32).reshape(-1)
    n = x.shape[0]

    # Lane tiling: edges on the last axis, tile a multiple of 128.
    n_lane = max(128, -(-n // 128) * 128)
    tile = max(128, min(int(tile_n), n_lane))
    tile = (tile // 128) * 128
    n_pad = -(-n // tile) * tile

    # Pad with a benign positive value (avoids 1/0 on padded lanes; sliced off).
    x_pad = jnp.pad(x, (0, n_pad - n), constant_values=1.0).reshape(1, n_pad)

    kernel = functools.partial(
        _radial_embedding_kernel,
        prefactor=math.sqrt(2.0 / r_max),
        r_max=float(r_max),
        p=int(num_polynomial_cutoff),
    )

    out_bn = pl.pallas_call(
        kernel,
        out_shape=jax.ShapeDtypeStruct((num_bessel, n_pad), out_dtype),
        grid_spec=pltpu.PrefetchScalarGridSpec(
            num_scalar_prefetch=0,
            grid=(n_pad // tile,),
            in_specs=[pl.BlockSpec((1, tile), lambda i: (0, i))],
            out_specs=pl.BlockSpec((num_bessel, tile), lambda i: (0, i)),
        ),
        compiler_params=pltpu.CompilerParams(
            dimension_semantics=("parallel",)),
    )(x_pad)

    out_bn = out_bn[:, :n]                    # drop lane padding
    if transpose_output:
        return out_bn.T                       # [N, num_bessel] (module semantics)
    return out_bn                             # [num_bessel, N] lane-major


def _reference(edge_lengths, *, r_max, num_bessel, num_polynomial_cutoff):
    """Pure-JAX reference matching the PyTorch module."""
    w = (math.pi / r_max) * jnp.linspace(1.0, float(num_bessel), num_bessel,
                                         dtype=jnp.float32)
    prefactor = math.sqrt(2.0 / r_max)
    bessel = prefactor * jnp.sin(edge_lengths * w) / edge_lengths
    p = float(num_polynomial_cutoff)
    u = edge_lengths / r_max
    env = (1.0
           - (p + 1.0) * (p + 2.0) / 2.0 * u ** p
           + p * (p + 2.0) * u ** (p + 1.0)
           - p * (p + 1.0) / 2.0 * u ** (p + 2.0))
    cutoff = env * (edge_lengths < r_max).astype(jnp.float32)
    return bessel * cutoff


if __name__ == "__main__":
    r_max = 5.0
    num_bessel = 8
    num_polynomial_cutoff = 6
    n_edges = 64

    key = jax.random.PRNGKey(0)
    # Positive edge lengths in (0.1, 1.2*r_max) so some edges exceed the cutoff.
    edge_lengths = jax.random.uniform(
        key, (n_edges, 1), dtype=jnp.float32, minval=0.1, maxval=1.2 * r_max
    )

    out = radial_embedding_block(
        edge_lengths,
        r_max=r_max,
        num_bessel=num_bessel,
        num_polynomial_cutoff=num_polynomial_cutoff,
    )
    out = jax.block_until_ready(out)

    ref = _reference(
        edge_lengths,
        r_max=r_max,
        num_bessel=num_bessel,
        num_polynomial_cutoff=num_polynomial_cutoff,
    )
    assert out.shape == (n_edges, num_bessel)
    assert jnp.allclose(out, ref, atol=1e-5, rtol=1e-4), "mismatch vs reference"

    print("KERNEL_OK")
</pallas_src>

<mosaic_0001>
module attributes {stable_mosaic.version = 11 : i64} {
  func.func @_radial_embedding_kernel(%arg0: i32, %arg1: memref<1x128xf32, #tpu.memory_space<vmem>>, %arg2: memref<8x128xf32, #tpu.memory_space<vmem>>) attributes {dimension_semantics = [#tpu.dimension_semantics<parallel>], iteration_bounds = array<i64: 1>, scalar_prefetch = 0 : i64, scratch_operands = 0 : i64, tpu.core_type = #tpu.core_type<tc>, window_params = [{transform_indices = @transform_0, window_bounds = array<i64: 1, 128>}, {transform_indices = @transform_1, window_bounds = array<i64: 8, 128>}]} {
    %c0 = arith.constant 0 : index
    %c0_0 = arith.constant 0 : index
    %0 = vector.load %arg1[%c0, %c0_0] : memref<1x128xf32, #tpu.memory_space<vmem>>, vector<1x128xf32>
    %1 = tpu.iota {dimensions = array<i32: 0>} : vector<8x1xi32>
    %2 = arith.sitofp %1 : vector<8x1xi32> to vector<8x1xf32>
    %cst = arith.constant 1.000000e+00 : f32
    %3 = vector.broadcast %cst : f32 to vector<8x1xf32>
    %4 = arith.addf %2, %3 : vector<8x1xf32>
    %cst_1 = arith.constant 0.628318548 : f32
    %5 = vector.broadcast %cst_1 : f32 to vector<8x1xf32>
    %6 = arith.mulf %5, %4 : vector<8x1xf32>
    %cst_2 = arith.constant 2.000000e-01 : f32
    %7 = vector.broadcast %cst_2 : f32 to vector<1x128xf32>
    %8 = arith.mulf %0, %7 : vector<1x128xf32>
    %9 = arith.mulf %8, %8 : vector<1x128xf32>
    %10 = arith.mulf %9, %9 : vector<1x128xf32>
    %11 = arith.mulf %9, %10 : vector<1x128xf32>
    %cst_3 = arith.constant -2.100000e+01 : f32
    %12 = vector.broadcast %cst_3 : f32 to vector<1x128xf32>
    %13 = arith.mulf %12, %8 : vector<1x128xf32>
    %cst_4 = arith.constant 4.800000e+01 : f32
    %14 = vector.broadcast %cst_4 : f32 to vector<1x128xf32>
    %15 = arith.addf %14, %13 : vector<1x128xf32>
    %16 = arith.mulf %8, %15 : vector<1x128xf32>
    %cst_5 = arith.constant -2.800000e+01 : f32
    %17 = vector.broadcast %cst_5 : f32 to vector<1x128xf32>
    %18 = arith.addf %17, %16 : vector<1x128xf32>
    %19 = arith.mulf %11, %18 : vector<1x128xf32>
    %cst_6 = arith.constant 1.000000e+00 : f32
    %20 = vector.broadcast %cst_6 : f32 to vector<1x128xf32>
    %21 = arith.addf %20, %19 : vector<1x128xf32>
    %cst_7 = arith.constant 5.000000e+00 : f32
    %22 = vector.broadcast %cst_7 : f32 to vector<1x128xf32>
    %23 = arith.cmpf olt, %0, %22 : vector<1x128xf32>
    %24 = arith.extui %23 : vector<1x128xi1> to vector<1x128xi32>
    %25 = arith.sitofp %24 : vector<1x128xi32> to vector<1x128xf32>
    %cst_8 = arith.constant 0.632455527 : f32
    %26 = vector.broadcast %cst_8 : f32 to vector<1x128xf32>
    %27 = arith.mulf %26, %21 : vector<1x128xf32>
    %28 = arith.mulf %27, %25 : vector<1x128xf32>
    %29 = arith.divf %28, %0 : vector<1x128xf32>
    %30 = vector.broadcast %6 : vector<8x1xf32> to vector<8x128xf32>
    %31 = vector.broadcast %0 : vector<1x128xf32> to vector<8x128xf32>
    %32 = arith.mulf %30, %31 : vector<8x128xf32>
    %33 = math.sin %32 : vector<8x128xf32>
    %34 = vector.broadcast %29 : vector<1x128xf32> to vector<8x128xf32>
    %35 = arith.mulf %33, %34 : vector<8x128xf32>
    %c0_9 = arith.constant 0 : index
    %c0_10 = arith.constant 0 : index
    %36 = vector.load %arg2[%c0_9, %c0_10] : memref<8x128xf32, #tpu.memory_space<vmem>>, vector<8x128xf32>
    tpu.vector_store %arg2[%c0_9, %c0_10], %35 {strides = array<i32>} : memref<8x128xf32, #tpu.memory_space<vmem>>, vector<8x128xf32>,
    return
  }
  func.func @transform_0(%arg0: i32) -> (i32, i32) {
    %c0_i32 = arith.constant 0 : i32
    %c0_i32_0 = arith.constant 0 : i32
    return %c0_i32, %arg0 : i32, i32
  }
  func.func @transform_1(%arg0: i32) -> (i32, i32) {
    %c0_i32 = arith.constant 0 : i32
    %c0_i32_0 = arith.constant 0 : i32
    return %c0_i32, %arg0 : i32, i32
  }
}

</mosaic_0001>

<bundles_post_ra>
// kernel: tpu_custom_call.1
= control target key start
LH: loop header
LB: loop body
LE: loop exit
PB: predicated region body
PF: predicated region fallthrough
CT: control target
= control target key end

     0   :  { %6 = vsyncpa [#allocation3], 0  ;;  %s404_s0 = inlined_call_operand.hbm [shape: f32[1,128], index: 0, kind: input, shape index: {}]   ;;  %s405_s1 = inlined_call_operand.hbm [shape: f32[8,128], index: 1, kind: output, shape index: {}]  }
   0x1   :  { %7 = vsyncpa [#allocation4], 0  ;;  %s13_s8 = sshll.u32 %s404_s0, 4  ;;  %s309_s9 = smov [#allocation2]   ;;  %s14_s8 = int_to_ptr.hbm [resolvable:$true] %s13_s8 }
   0x2   :  { %s15_s10 = sshll.u32 %s309_s9, 4  ;;  %s16_s10 = int_to_ptr.vmem [resolvable:$true] %s15_s10 }
   0x3   :  { %18 = dma.hbm_to_vmem [thread:$0]  %s14_s8, 16, %s16_s10, [#allocation3]  }
   0x4   :  { %305 = dma.done.wait [#allocation3], 16  }
   0x5   :  { %306 = vsyncadd [#allocation3], 4294967280  ;;  %v24_v0 = vlaneseq  ;;  %v254_v4 = vld [vmem:[#allocation2] ss:$0 sm:$0xff]  ;;  %v310_v18 = vmov 683565275  }
   0x6   :  { %v311_v20 = vmov 2475754826   ;;  %v312_v22 = vmov 2131351028   ;;  %v313_v24 = vmov 2102212464  }
   0x7   :  { %v25_v1 = vshrl.u32 %v24_v0, 7  ;;  %v314_v26 = vmov 920167782   ;;  %v315_v32 = vmov 1326507024   ;;  %s318_s0 = smov [#allocation5]  }
   0x8   :  { %s228_s11 = sshll.u32 %s318_s0, 4  ;;  %s230_s14 = sshll.u32 %s405_s1, 4  ;;  %s229_s11 = int_to_ptr.vmem [resolvable:$true] %s228_s11  ;;  %s231_s14 = int_to_ptr.hbm [resolvable:$true] %s230_s14 }
   0x9   :  { %v26_v2 = vcvt.s32.f32 %v25_v1 }
   0xb   :  { %v27_v3 = vadd.f32 1.0, %v26_v2 }
   0xd   :  { %v28_v5 = vmul.f32 0.62831855, %v27_v3 }
   0xf   :  { %v332_v6 = vmul.f32 %v254_v4, %v28_v5 }
  0x11   :  { %v66_v7 = vand.u32 2139095040, %v332_v6  ;;  %v63_v9 = vand.u32 2147483647, %v332_v6  ;;  %vm65_vm12 = vcmp.lt.s32.totalorder %v332_v6, 0 }
  0x13   :  { %v67_v8 = vshrl.u32 %v66_v7, 23  ;;  %v70_v12 = vand.u32 8388607, %v63_v9  ;;  %v316_v7 = vmov 0   ;;  %vm381_vm13 = vcmp.le.f32.partialorder %v63_v9, 0.7853982 }
  0x15   :  { %v241_v10 = vadd.s32 4294967169, %v67_v8  ;;  %v71_v15 = vor.u32 8388608, %v70_v12 }
  0x17   :  { %v73_v11 = vadd.s32 1, %v241_v10  ;;  %v341_v34 = vshll.u32 %v71_v15, 8 }
  0x19   :  { %vm74_vm0 = vcmp.gt.s32.totalorder %v73_v11, 0  ;;  %v112_v46 = vand.u32 65535, %v341_v34  ;;  %v113_v47 = vshrl.u32 %v341_v34, 16 }
  0x1a   :  { %v75_v13 = vsel %vm74_vm0, %v73_v11, 0 }
  0x1b   :  { %v77_v14 = vand.u32 31, %v75_v13  ;;  %v338_v16 = vshrl.u32 %v75_v13, 5 }
  0x1d   :  { %v78_v17 = vsub.s32 32, %v77_v14  ;;  %v80_v19 = vshll.u32 %v310_v18, %v77_v14  ;;  %v83_v21 = vshll.u32 %v311_v20, %v77_v14  ;;  %v86_v23 = vshll.u32 %v312_v22, %v77_v14 }
  0x1e   :  { %v89_v25 = vshll.u32 %v313_v24, %v77_v14  ;;  %v92_v27 = vshll.u32 %v314_v26, %v77_v14  ;;  %vm95_vm1 = vcmp.lt.s32.totalorder %v338_v16, 1  ;;  %vm98_vm2 = vcmp.lt.s32.totalorder %v338_v16, 4 }
  0x1f   :  { %v81_v28 = vshrl.u32 %v311_v20, %v78_v17  ;;  %v84_v29 = vshrl.u32 %v312_v22, %v78_v17  ;;  %v87_v30 = vshrl.u32 %v313_v24, %v78_v17  ;;  %v90_v31 = vshrl.u32 %v314_v26, %v78_v17 }
  0x20   :  { %v93_v33 = vshrl.u32 %v315_v32, %v78_v17  ;;  %vm97_vm3 = vcmp.lt.s32.totalorder %v338_v16, 3  ;;  %vm96_vm4 = vcmp.lt.s32.totalorder %v338_v16, 2  ;;  %v79_v54 = vshrl.u32 %v310_v18, %v78_v17 }
  0x21   :  { %v82_v35 = vor.u32 %v81_v28, %v80_v19  ;;  %v85_v36 = vor.u32 %v84_v29, %v83_v21  ;;  %v88_v37 = vor.u32 %v87_v30, %v86_v23  ;;  %v91_v38 = vor.u32 %v90_v31, %v89_v25 }
  0x22   :  { %v94_v39 = vor.u32 %v93_v33, %v92_v27 }
  0x23   :  { %v103_v40 = vsel %vm95_vm1, %v82_v35, %v85_v36  ;;  %v107_v41 = vsel %vm95_vm1, %v85_v36, %v88_v37  ;;  %v104_v42 = vsel %vm98_vm2, %v91_v38, 920167782  ;;  %v99_v3 = vsel %vm95_vm1, %v79_v54, %v82_v35 }
  0x24   :  { %v108_v43 = vsel %vm98_vm2, %v94_v39, 1326507024  ;;  %v105_v44 = vsel %vm97_vm3, %v88_v37, %v104_v42  ;;  %v100_v5 = vsel %vm98_vm2, %v88_v37, 2102212464  ;;  %v373_v39 = vld [vmem:[#allocation2] sm:$0x1] }
  0x25   :  { %v109_v45 = vsel %vm97_vm3, %v91_v38, %v108_v43  ;;  %v106_v48 = vsel %vm96_vm4, %v103_v40, %v105_v44  ;;  %v101_v18 = vsel %vm97_vm3, %v85_v36, %v100_v5  ;;  %v29_v16 = vmul.f32 0.2, %v373_v39 }
  0x26   :  { %v110_v49 = vsel %vm96_vm4, %v107_v41, %v109_v45  ;;  %v136_v52 = vand.u32 65535, %v106_v48  ;;  %v137_v53 = vshrl.u32 %v106_v48, 16  ;;  %v102_v26 = vsel %vm96_vm4, %v99_v3, %v101_v18 }
  0x27   :  { %v114_v50 = vand.u32 65535, %v110_v49  ;;  %v115_v51 = vshrl.u32 %v110_v49, 16  ;;  %v156_v30 = vmul.u32 %v341_v34, %v102_v26  ;;  %v33_v44 = vmul.f32 -21.0, %v29_v16 }
  0x28   :  { %v138_v58 = vmul.u32 %v136_v52, %v112_v46  ;;  %v139_v59 = vmul.u32 %v137_v53, %v112_v46  ;;  %v140_v60 = vmul.u32 %v136_v52, %v113_v47  ;;  %v141_v0 = vmul.u32 %v137_v53, %v113_v47 }
  0x29   :  { %v116_v55 = vmul.u32 %v114_v50, %v112_v46  ;;  %v117_v56 = vmul.u32 %v115_v51, %v112_v46  ;;  %v118_v57 = vmul.u32 %v114_v50, %v113_v47  ;;  %v119_v61 = vmul.u32 %v115_v51, %v113_v47 }
  0x2a   :  { %v142_v1 = vshll.u32 %v139_v59, 16  ;;  %v144_v2 = vshll.u32 %v140_v60, 16  ;;  %v143_v15 = vshrl.u32 %v139_v59, 16  ;;  %v145_v22 = vshrl.u32 %v140_v60, 16 }
  0x2b   :  { %v120_v62 = vshll.u32 %v117_v56, 16  ;;  %v122_v63 = vshll.u32 %v118_v57, 16  ;;  %v121_v11 = vshrl.u32 %v117_v56, 16  ;;  %v123_v19 = vshrl.u32 %v118_v57, 16 }
  0x2c   :  { %vm146_vm6 = vc.u32 %v138_v58, %v142_v1  ;;  %v148_v10 = vadd.s32 %v142_v1, %v138_v58  ;;  %255 = vrcp.f32 %v373_v39  ;;  %v30_v49 = vmul.f32 %v29_v16, %v29_v16 }
  0x2d   :  { %vm124_vm5 = vc.u32 %v116_v55, %v120_v62  ;;  %v126_v4 = vadd.s32 %v120_v62, %v116_v55  ;;  %v147_v13 = vsel %vm146_vm6, 1, %v316_v7  ;;  %v34_v50 = vadd.f32 48.0, %v33_v44 }
  0x2e   :  { %v125_v8 = vsel %vm124_vm5, 1, %v316_v7  ;;  %v149_v17 = vadd.s32 %v147_v13, %v141_v0  ;;  %vm150_vm8 = vc.u32 %v148_v10, %v144_v2  ;;  %v152_v25 = vadd.s32 %v148_v10, %v144_v2 }
  0x2f   :  { %v127_v12 = vadd.s32 %v125_v8, %v119_v61  ;;  %vm128_vm7 = vc.u32 %v126_v4, %v122_v63  ;;  %v151_v21 = vsel %vm150_vm8, 1, %v316_v7  ;;  %v31_v56 = vmul.f32 %v30_v49, %v30_v49 }
  0x30   :  { %v129_v14 = vsel %vm128_vm7, 1, %v316_v7  ;;  %v153_v23 = vadd.s32 %v151_v21, %v149_v17  ;;  %v35_v57 = vmul.f32 %v34_v50, %v29_v16  ;;  %vm49_vm14 = vweird.f32 %v373_v39 }
  0x31   :  { %v131_v20 = vadd.s32 %v129_v14, %v127_v12  ;;  %v32_v62 = vmul.f32 %v31_v56, %v30_v49  ;;  %v55_v14 = vand.u32 2147483648, %v373_v39  ;;  %vm39_vm0 = vcmp.lt.f32.partialorder %v373_v39, 5.0 }
  0x32   :  { %v154_v27 = vadd.s32 %v153_v23, %v143_v15  ;;  %v256_v53 = vpop.eup %255  ;;  %v36_v63 = vadd.f32 -28.0, %v35_v57  ;;  %vm206_vm6 = vweird.f32 %v332_v6 }
  0x33   :  { %v132_v24 = vadd.s32 %v131_v20, %v121_v11  ;;  %v45_v60 = vmul.f32 %v256_v53, %v373_v39  ;;  %vm50_vm15 = vweird.f32 %v256_v53 }
  0x34   :  { %v155_v29 = vadd.s32 %v154_v27, %v145_v22  ;;  %v37_v5 = vmul.f32 %v36_v63, %v32_v62  ;;  %vm394_vm1 = vmor %vm49_vm14, %vm50_vm15  ;;  %v56_v27 = vor.u32 1.1754944e-38, %v55_v14 }
  0x35   :  { %v133_v28 = vadd.s32 %v132_v24, %v123_v19  ;;  %v46_v1 = vsub.f32 1.0, %v45_v60  ;;  %v53_v19 = vand.u32 2147483647, %v373_v39 }
  0x36   :  { %v159_v31 = vadd.s32 1, %v155_v29  ;;  %v38_v13 = vadd.f32 1.0, %v37_v5 }
  0x37   :  { %vm158_vm9 = vc.u32 %v133_v28, %v152_v25  ;;  %v157_v34 = vadd.s32 %v152_v25, %v133_v28  ;;  %v47_v8 = vmul.f32 %v256_v53, %v46_v1  ;;  %v317_v25 = vmov 0.0  }
  0x38   :  { %v160_v32 = vsel %vm158_vm9, %v159_v31, %v155_v29  ;;  %v42_v23 = vmul.f32 0.6324555, %v38_v13  ;;  %v240_v26 = vsel %vm39_vm0, 1.0, %v317_v25  ;;  %vm54_vm2 = vcmp.eq.f32.partialorder %v53_v19, 8.507059e+37 }
  0x39   :  { %v161_v33 = vadd.s32 %v160_v32, %v156_v30  ;;  %v48_v18 = vadd.f32 %v256_v53, %v47_v8 }
  0x3b   :  { %v162_v35 = vadd.s32 536870912, %v161_v33  ;;  %v52_v30 = vsel %vm394_vm1, %v256_v53, %v48_v18 }
  0x3d   :  { %v163_v36 = vshrl.u32 %v162_v35, 30 }
  0x3f   :  { %v164_v37 = vshll.u32 %v163_v36, 30  ;;  %v187_v2 = vsub.s32 4, %v163_v36 }
  0x41   :  { %v165_v38 = vsub.s32 %v161_v33, %v164_v37  ;;  %v188_v10 = vsel %vm65_vm12, %v187_v2, %v163_v36  ;;  %v43_v33 = vmul.f32 %v240_v26, %v42_v23  ;;  %v57_v36 = vsel %vm54_vm2, %v56_v27, %v52_v30 }
  0x42   :  { %v190_v9 = vsel %vm381_vm13, 0, %v188_v10 }
  0x43   :  { %vm166_vm10 = vcmp.lt.s32.totalorder %v165_v38, 0  ;;  %v167_v40 = vsub.s32 0, %v165_v38  ;;  %v207_v24 = vadd.s32 3, %v190_v9  ;;  %v58_v16 = vmul.f32 %v57_v36, %v43_v33 }
  0x45   :  { %v168_v41 = vsel %vm166_vm10, %v167_v40, %v165_v38  ;;  %v208_v35 = vand.u32 3, %v207_v24 }
  0x46   :  { %v169_v42 = vclz %v168_v41 }
  0x47   :  { %vm213_vm3 = vcmp.eq.s32.totalorder %v208_v35, 2  ;;  %vm210_vm4 = vcmp.eq.s32.totalorder %v208_v35, 0  ;;  %vm209_vm5 = vcmp.lt.s32.totalorder %v208_v35, 2 }
  0x48   :  { %v242_v43 = vadd.s32 4294967294, %v169_v42 }
  0x4a   :  { %vm243_vm11 = vcmp.lt.s32.totalorder %v242_v43, 0 }
  0x4b   :  { %v172_v45 = vsel %vm243_vm11, 0, %v242_v43 }
  0x4c   :  { %v173_v46 = vsub.s32 32, %v172_v45  ;;  %v174_v47 = vshll.u32 %v165_v38, %v172_v45  ;;  %v177_v48 = vsub.s32 4294967266, %v172_v45 }
  0x4e   :  { %v175_v51 = vshrl.u32 %v157_v34, %v173_v46  ;;  %v178_v52 = vadd.s32 127, %v177_v48  ;;  %v219_v34 = vperm.slane %v58_v16, 0 }
  0x50   :  { %v176_v54 = vor.u32 %v175_v51, %v174_v47  ;;  %v179_v55 = vshll.u32 %v178_v52, 23 }
  0x52   :  { %v180_v58 = vor.u32 4788187, %v179_v55  ;;  %v183_v59 = vcvt.s32.f32 %v176_v54 }
  0x54   :  { %v181_v61 = vand.u32 2147483647, %v180_v58 }
  0x56   :  { %v184_v0 = vmul.f32 %v183_v59, %v181_v61 }
  0x58   :  { %v185_v4 = vxor.u32 2147483648, %v184_v0 }
  0x5a   :  { %v186_v7 = vsel %vm65_vm12, %v185_v4, %v184_v0 }
  0x5b   :  { %v189_v11 = vsel %vm381_vm13, %v332_v6, %v186_v7 }
  0x5c   :  { %v191_v12 = vmul.f32 %v189_v11, %v189_v11 }
  0x5e   :  { %v192_v15 = vmul.f32 -0.001358992, %v191_v12  ;;  %v199_v17 = vmul.f32 -0.00019511016, %v191_v12 }
  0x60   :  { %v193_v21 = vadd.f32 0.041655596, %v192_v15  ;;  %v200_v22 = vadd.f32 0.008332121, %v199_v17 }
  0x62   :  { %v194_v28 = vmul.f32 %v193_v21, %v191_v12  ;;  %v201_v29 = vmul.f32 %v200_v22, %v191_v12 }
  0x64   :  { %v195_v31 = vadd.f32 -0.4999988, %v194_v28  ;;  %v202_v32 = vadd.f32 -0.16666654, %v201_v29 }
  0x66   :  { %v196_v37 = vmul.f32 %v195_v31, %v191_v12  ;;  %v203_v38 = vmul.f32 %v202_v32, %v191_v12 }
  0x68   :  { %v197_v39 = vadd.f32 1.0, %v196_v37  ;;  %v204_v40 = vadd.f32 1.0, %v203_v38 }
  0x6a   :  { %v205_v41 = vmul.f32 %v204_v40, %v189_v11  ;;  %v214_v42 = vxor.u32 2147483648, %v197_v39 }
  0x6c   :  { %v211_v43 = vxor.u32 2147483648, %v205_v41  ;;  %v215_v44 = vsel %vm213_vm3, %v214_v42, %v205_v41 }
  0x6e   :  { %v212_v45 = vsel %vm210_vm4, %v197_v39, %v211_v43 }
  0x6f   :  { %v216_v46 = vsel %vm209_vm5, %v212_v45, %v215_v44 }
  0x70   :  { %v217_v47 = vsel %vm206_vm6, nan, %v216_v46 }
  0x71   :  { %v221_v48 = vmul.f32 %v219_v34, %v217_v47 }
  0x73   :  { %222 = vst [vmem:[#allocation5] sm:$0xff] %v221_v48 }
  0x74   :  { %233 = dma.vmem_to_hbm [thread:$0]  %s229_s11, 128, %s231_s14, [#allocation4]  }
  0x75   :  { %307 = dma.done.wait [#allocation4], 128  }
  0x76   :  { %308 = vsyncadd [#allocation4], 4294967168 }
  0x77   :  { %238 = vsyncpa [#allocation3], 1 }
  0x78   :  { %239 = vsyncpa [#allocation4], 1 }

</bundles_post_ra>
